<compile_context>
chip_gen: v6e
topology: v6e:2x2x1
jax: 0.10.0
libtpu: 0.0.40
codegen_flags: <defaults>
</compile_context>

<pallas_src>
import functools

import jax
import jax.numpy as jnp
from jax.experimental import pallas as pl
from jax.experimental.pallas import tpu as pltpu


def _sam_kernel(taps_ref, x_ref, o_ref, *, kernel_size, pad):
    # taps_ref: (2, K) f32 in SMEM  (row 0 = max branch, row 1 = avg branch)
    # x_ref / o_ref: (TC, H, W) VMEM tile (batch dim squeezed by BlockSpec)
    x = x_ref[...]                                        # native dtype, (TC, H, W)
    tc, _, w = x_ref.shape

    avg = jnp.mean(x, axis=1, dtype=jnp.float32)          # (TC, W), f32 accumulation
    mx = jnp.max(x, axis=1).astype(jnp.float32)           # (TC, W)

    # K-tap zero-padded cross-correlation along W as shifted FMAs:
    #   v[c, w] = sum_j taps[0,j]*mx[c, w+j-pad] + taps[1,j]*avg[c, w+j-pad]
    lane = jax.lax.broadcasted_iota(jnp.int32, (tc, w), 1)
    v = jnp.zeros((tc, w), jnp.float32)
    for j in range(kernel_size):
        off = j - pad                                      # static Python int
        if off == 0:
            mx_s, avg_s = mx, avg
        else:
            valid = (lane + off >= 0) & (lane + off < w)   # zero-padding mask
            shift = (-off) % w                             # roll so result[w] = src[w+off]
            mx_s = jnp.where(valid, pltpu.roll(mx, shift=shift, axis=1), 0.0)
            avg_s = jnp.where(valid, pltpu.roll(avg, shift=shift, axis=1), 0.0)
        v = v + taps_ref[0, j] * mx_s + taps_ref[1, j] * avg_s

    att = jax.nn.sigmoid(v)                                # (TC, W) f32
    o_ref[...] = (x * att[:, None, :].astype(x.dtype)).astype(o_ref.dtype)


def _pick_channel_tile(C, H, W, itemsize, vmem_budget_bytes):
    # Working set per grid step ~= (in tile + out tile) x double buffering.
    per_channel = 4 * H * W * itemsize
    max_tc = max(1, vmem_budget_bytes // per_channel)
    tile = 1
    for cand in range(1, C + 1):
        if C % cand == 0 and cand <= max_tc:
            tile = cand
    return tile


def spatial_attention(x, conv_weight, *, channel_tile=None,
                      vmem_budget_bytes=8 * 1024 * 1024):
    """x: (B, C, H, W); conv_weight: (1, 2, 1, K) — channel 0 = max branch, 1 = avg."""
    B, C, H, W = x.shape
    O, I, KH, K = conv_weight.shape
    assert (O, I, KH) == (1, 2, 1), "expected Conv2d(2, 1, (1, K), bias=False) weight"
    assert K % 2 == 1, "odd kernel_size assumed so conv output width == W"
    pad = (K - 1) // 2

    # Tiny (2, K) tap table, read as scalars from SMEM inside the kernel.
    taps = conv_weight[0, :, 0, :].astype(jnp.float32)     # (2, K)

    if channel_tile is None:
        channel_tile = _pick_channel_tile(C, H, W, x.dtype.itemsize, vmem_budget_bytes)
    assert C % channel_tile == 0, "channel_tile must divide C"
    # TODO(synk): if H*W alone exceeds the VMEM budget (channel_tile==1 still too big),
    # add an "arbitrary" H grid axis with running max/sum accumulators instead of
    # shrinking the channel tile further.

    kernel = functools.partial(_sam_kernel, kernel_size=K, pad=pad)
    xo_spec = pl.BlockSpec((None, channel_tile, H, W), lambda b, c: (b, c, 0, 0))

    return pl.pallas_call(
        kernel,
        out_shape=jax.ShapeDtypeStruct((B, C, H, W), x.dtype),
        grid=(B, C // channel_tile),
        in_specs=[
            pl.BlockSpec(memory_space=pltpu.MemorySpace.SMEM),   # taps (2, K)
            xo_spec,                                             # x tile
        ],
        out_specs=xo_spec,
        compiler_params=pltpu.CompilerParams(
            dimension_semantics=("parallel", "parallel")),
    )(taps, x)


def spatial_attention_ref(x, conv_weight):
    """Pure-JAX reference matching the PyTorch forward exactly."""
    K = conv_weight.shape[-1]
    pad = (K - 1) // 2
    avg = jnp.mean(x, axis=2, keepdims=True)                 # (B, C, 1, W)
    mx = jnp.max(x, axis=2, keepdims=True)                   # (B, C, 1, W)
    cat = jnp.concatenate([mx, avg], axis=2)                 # (B, C, 2, W)
    perm = jnp.transpose(cat, (0, 2, 1, 3))                  # (B, 2, C, W)
    v = jax.lax.conv_general_dilated(
        perm, conv_weight, window_strides=(1, 1),
        padding=((0, 0), (pad, pad)),
        dimension_numbers=("NCHW", "OIHW", "NCHW"))          # (B, 1, C, W)
    v = jnp.transpose(v, (0, 2, 1, 3))                       # (B, C, 1, W)
    return x * jax.nn.sigmoid(v)


if __name__ == "__main__":
    key = jax.random.PRNGKey(0)
    kx, kw = jax.random.split(key)

    B, C, H, W, K = 2, 4, 16, 16, 3
    x = jax.random.normal(kx, (B, C, H, W), dtype=jnp.float32)
    # Deterministic Conv2d(2, 1, (1, K), bias=False) weight; PyTorch-style uniform bound.
    bound = 1.0 / (2 * K) ** 0.5
    conv_weight = jax.random.uniform(kw, (1, 2, 1, K), jnp.float32, -bound, bound)

    ref = spatial_attention_ref(x, conv_weight)

    # Auto-picked channel tile (covers the default path).
    out = jax.block_until_ready(spatial_attention(x, conv_weight))
    assert out.shape == ref.shape and out.dtype == ref.dtype
    err = float(jnp.max(jnp.abs(out - ref)))
    assert err < 1e-4, f"mismatch vs reference (auto tile): {err}"

    # Explicit channel tile -> exercises the (B, C//TC) grid with TC < C.
    out2 = jax.block_until_ready(spatial_attention(x, conv_weight, channel_tile=2))
    err2 = float(jnp.max(jnp.abs(out2 - ref)))
    assert err2 < 1e-4, f"mismatch vs reference (channel_tile=2): {err2}"

    print("KERNEL_OK")
</pallas_src>

<mosaic_0001>
module attributes {stable_mosaic.version = 11 : i64} {
  func.func @_sam_kernel(%arg0: i32, %arg1: i32, %arg2: memref<2x3xf32, #tpu.memory_space<smem>>, %arg3: memref<1x4x16x16xf32, #tpu.memory_space<vmem>>, %arg4: memref<1x4x16x16xf32, #tpu.memory_space<vmem>>) attributes {dimension_semantics = [#tpu.dimension_semantics<parallel>, #tpu.dimension_semantics<parallel>], iteration_bounds = array<i64: 2, 1>, scalar_prefetch = 0 : i64, scratch_operands = 0 : i64, tpu.core_type = #tpu.core_type<tc>, window_params = [{transform_indices = @transform_0, window_bounds = array<i64: 2, 3>}, {transform_indices = @transform_1, window_bounds = array<i64: 1, 4, 16, 16>}, {transform_indices = @transform_2, window_bounds = array<i64: 1, 4, 16, 16>}]} {
    %c0 = arith.constant 0 : index
    %c0_0 = arith.constant 0 : index
    %c0_1 = arith.constant 0 : index
    %c0_2 = arith.constant 0 : index
    %0 = vector.load %arg3[%c0, %c0_0, %c0_1, %c0_2] : memref<1x4x16x16xf32, #tpu.memory_space<vmem>>, vector<1x4x16x16xf32>
    %1 = vector.shape_cast %0 : vector<1x4x16x16xf32> to vector<4x16x16xf32>
    %cst = arith.constant dense<0.000000e+00> : vector<4x16xf32>
    %2 = vector.multi_reduction <add>, %1, %cst [1] : vector<4x16x16xf32> to vector<4x16xf32>
    %cst_3 = arith.constant 1.600000e+01 : f32
    %3 = vector.broadcast %cst_3 : f32 to vector<4x16xf32>
    %4 = arith.divf %2, %3 : vector<4x16xf32>
    %cst_4 = arith.constant dense<0xFF800000> : vector<4x16xf32>
    %5 = vector.multi_reduction <maximumf>, %1, %cst_4 [1] : vector<4x16x16xf32> to vector<4x16xf32>
    %6 = tpu.iota {dimensions = array<i32: 1>} : vector<4x16xi32>
    %cst_5 = arith.constant 0.000000e+00 : f32
    %7 = vector.broadcast %cst_5 : f32 to vector<4x16xf32>
    %c-1_i32 = arith.constant -1 : i32
    %8 = vector.broadcast %c-1_i32 : i32 to vector<4x16xi32>
    %9 = arith.addi %6, %8 : vector<4x16xi32>
    %c0_i32 = arith.constant 0 : i32
    %10 = vector.broadcast %c0_i32 : i32 to vector<4x16xi32>
    %11 = arith.cmpi sge, %9, %10 : vector<4x16xi32>
    %c-1_i32_6 = arith.constant -1 : i32
    %12 = vector.broadcast %c-1_i32_6 : i32 to vector<4x16xi32>
    %13 = arith.addi %6, %12 : vector<4x16xi32>
    %c16_i32 = arith.constant 16 : i32
    %14 = vector.broadcast %c16_i32 : i32 to vector<4x16xi32>
    %15 = arith.cmpi slt, %13, %14 : vector<4x16xi32>
    %16 = arith.andi %11, %15 : vector<4x16xi1>
    %c1_i32 = arith.constant 1 : i32
    %17 = tpu.dynamic_rotate %5 by %c1_i32 dim 1 : vector<4x16xf32>, i32 -> vector<4x16xf32>
    %cst_7 = arith.constant 0.000000e+00 : f32
    %18 = vector.broadcast %cst_7 : f32 to vector<4x16xf32>
    %19 = arith.select %16, %17, %18 : vector<4x16xi1>, vector<4x16xf32>
    %c1_i32_8 = arith.constant 1 : i32
    %20 = tpu.dynamic_rotate %4 by %c1_i32_8 dim 1 : vector<4x16xf32>, i32 -> vector<4x16xf32>
    %cst_9 = arith.constant 0.000000e+00 : f32
    %21 = vector.broadcast %cst_9 : f32 to vector<4x16xf32>
    %22 = arith.select %16, %20, %21 : vector<4x16xi1>, vector<4x16xf32>
    %c0_10 = arith.constant 0 : index
    %c0_11 = arith.constant 0 : index
    %23 = memref.load %arg2[%c0_10, %c0_11] : memref<2x3xf32, #tpu.memory_space<smem>>
    %24 = vector.broadcast %23 : f32 to vector<4x16xf32>
    %25 = arith.mulf %24, %19 : vector<4x16xf32>
    %26 = arith.addf %7, %25 : vector<4x16xf32>
    %c1 = arith.constant 1 : index
    %c0_12 = arith.constant 0 : index
    %27 = memref.load %arg2[%c1, %c0_12] : memref<2x3xf32, #tpu.memory_space<smem>>
    %28 = vector.broadcast %27 : f32 to vector<4x16xf32>
    %29 = arith.mulf %28, %22 : vector<4x16xf32>
    %30 = arith.addf %26, %29 : vector<4x16xf32>
    %c0_13 = arith.constant 0 : index
    %c1_14 = arith.constant 1 : index
    %31 = memref.load %arg2[%c0_13, %c1_14] : memref<2x3xf32, #tpu.memory_space<smem>>
    %32 = vector.broadcast %31 : f32 to vector<4x16xf32>
    %33 = arith.mulf %32, %5 : vector<4x16xf32>
    %34 = arith.addf %30, %33 : vector<4x16xf32>
    %c1_15 = arith.constant 1 : index
    %c1_16 = arith.constant 1 : index
    %35 = memref.load %arg2[%c1_15, %c1_16] : memref<2x3xf32, #tpu.memory_space<smem>>
    %36 = vector.broadcast %35 : f32 to vector<4x16xf32>
    %37 = arith.mulf %36, %4 : vector<4x16xf32>
    %38 = arith.addf %34, %37 : vector<4x16xf32>
    %c1_i32_17 = arith.constant 1 : i32
    %39 = vector.broadcast %c1_i32_17 : i32 to vector<4x16xi32>
    %40 = arith.addi %6, %39 : vector<4x16xi32>
    %c0_i32_18 = arith.constant 0 : i32
    %41 = vector.broadcast %c0_i32_18 : i32 to vector<4x16xi32>
    %42 = arith.cmpi sge, %40, %41 : vector<4x16xi32>
    %c1_i32_19 = arith.constant 1 : i32
    %43 = vector.broadcast %c1_i32_19 : i32 to vector<4x16xi32>
    %44 = arith.addi %6, %43 : vector<4x16xi32>
    %c16_i32_20 = arith.constant 16 : i32
    %45 = vector.broadcast %c16_i32_20 : i32 to vector<4x16xi32>
    %46 = arith.cmpi slt, %44, %45 : vector<4x16xi32>
    %47 = arith.andi %42, %46 : vector<4x16xi1>
    %c15_i32 = arith.constant 15 : i32
    %48 = tpu.dynamic_rotate %5 by %c15_i32 dim 1 : vector<4x16xf32>, i32 -> vector<4x16xf32>
    %cst_21 = arith.constant 0.000000e+00 : f32
    %49 = vector.broadcast %cst_21 : f32 to vector<4x16xf32>
    %50 = arith.select %47, %48, %49 : vector<4x16xi1>, vector<4x16xf32>
    %c15_i32_22 = arith.constant 15 : i32
    %51 = tpu.dynamic_rotate %4 by %c15_i32_22 dim 1 : vector<4x16xf32>, i32 -> vector<4x16xf32>
    %cst_23 = arith.constant 0.000000e+00 : f32
    %52 = vector.broadcast %cst_23 : f32 to vector<4x16xf32>
    %53 = arith.select %47, %51, %52 : vector<4x16xi1>, vector<4x16xf32>
    %c0_24 = arith.constant 0 : index
    %c2 = arith.constant 2 : index
    %54 = memref.load %arg2[%c0_24, %c2] : memref<2x3xf32, #tpu.memory_space<smem>>
    %55 = vector.broadcast %54 : f32 to vector<4x16xf32>
    %56 = arith.mulf %55, %50 : vector<4x16xf32>
    %57 = arith.addf %38, %56 : vector<4x16xf32>
    %c1_25 = arith.constant 1 : index
    %c2_26 = arith.constant 2 : index
    %58 = memref.load %arg2[%c1_25, %c2_26] : memref<2x3xf32, #tpu.memory_space<smem>>
    %59 = vector.broadcast %58 : f32 to vector<4x16xf32>
    %60 = arith.mulf %59, %53 : vector<4x16xf32>
    %61 = arith.addf %57, %60 : vector<4x16xf32>
    %62 = arith.negf %61 : vector<4x16xf32>
    %63 = math.exp %62 : vector<4x16xf32>
    %cst_27 = arith.constant 1.000000e+00 : f32
    %64 = vector.broadcast %cst_27 : f32 to vector<4x16xf32>
    %65 = arith.addf %64, %63 : vector<4x16xf32>
    %66 = arith.divf %64, %65 : vector<4x16xf32>
    %67 = vector.shape_cast %66 : vector<4x16xf32> to vector<4x1x16xf32>
    %68 = vector.broadcast %67 : vector<4x1x16xf32> to vector<4x16x16xf32>
    %69 = arith.mulf %1, %68 : vector<4x16x16xf32>
    %c0_28 = arith.constant 0 : index
    %c0_29 = arith.constant 0 : index
    %c0_30 = arith.constant 0 : index
    %c0_31 = arith.constant 0 : index
    %70 = vector.load %arg4[%c0_28, %c0_29, %c0_30, %c0_31] : memref<1x4x16x16xf32, #tpu.memory_space<vmem>>, vector<1x4x16x16xf32>
    %71 = vector.shape_cast %70 : vector<1x4x16x16xf32> to vector<4x16x16xf32>
    %72 = vector.shape_cast %69 : vector<4x16x16xf32> to vector<1x4x16x16xf32>
    tpu.vector_store %arg4[%c0_28, %c0_29, %c0_30, %c0_31], %72 {strides = array<i32>} : memref<1x4x16x16xf32, #tpu.memory_space<vmem>>, vector<1x4x16x16xf32>,
    return
  }
  func.func @transform_0(%arg0: i32, %arg1: i32) -> (i32, i32) {
    %c0_i32 = arith.constant 0 : i32
    %c0_i32_0 = arith.constant 0 : i32
    %c0_i32_1 = arith.constant 0 : i32
    return %c0_i32, %c0_i32_0 : i32, i32
  }
  func.func @transform_1(%arg0: i32, %arg1: i32) -> (i32, i32, i32, i32) {
    %c0_i32 = arith.constant 0 : i32
    %c0_i32_0 = arith.constant 0 : i32
    %c0_i32_1 = arith.constant 0 : i32
    return %arg0, %arg1, %c0_i32, %c0_i32_0 : i32, i32, i32, i32
  }
  func.func @transform_2(%arg0: i32, %arg1: i32) -> (i32, i32, i32, i32) {
    %c0_i32 = arith.constant 0 : i32
    %c0_i32_0 = arith.constant 0 : i32
    %c0_i32_1 = arith.constant 0 : i32
    return %arg0, %arg1, %c0_i32, %c0_i32_0 : i32, i32, i32, i32
  }
}

</mosaic_0001>

<bundles_post_ra>
// kernel: tpu_custom_call.1
= control target key start
LH: loop header
LB: loop body
LE: loop exit
PB: predicated region body
PF: predicated region fallthrough
CT: control target
= control target key end

     0   :  { %s1078_s0 = inlined_call_operand.hbm [shape: f32[2,3], index: 0, kind: input, shape index: {}]   ;;  %s1079_s1 = inlined_call_operand.hbm [shape: f32[2,4,16,16], index: 1, kind: input, shape index: {}]   ;;  %s1080_s2 = inlined_call_operand.hbm [shape: f32[2,4,16,16], index: 2, kind: output, shape index: {}]  }
   0x1   :  { %1081 = sst [smem:[#allocation11_spill]] %s1078_s0 }
   0x2   :  { %7 = vsyncpa [#allocation5], 0 }
   0x3   :  { %8 = vsyncpa [#allocation3], 0 }
   0x4   :  { %10 = vsyncpa [#allocation3 + $0x1], 0 }
   0x5   :  { %11 = vsyncpa [#allocation4], 0 }
   0x6   :  { %13 = vsyncpa [#allocation4 + $0x1], 0  ;;  %s831_s9 = smov 0   ;;  %s833_s10 = smov 0  }
   0x7   :  { %s835_s11 = smov 0   ;;  %s837_s12 = smov 0  }
   0x8   :  { %s839_s13 = smov 0   ;;  %s841_s14 = smov 0  }
   0x9 LB: > { %s570_s15 = sadd.s32 4294967295, %s803_s14   ;;  %s571_s16 = sadd.s32 4294967294, %s803_s14   ;;  %s803_s14 = sphi %s841_s14, %s19_s14   ;;  %s799_s13 = sphi %s839_s13, %s1095_s13   ;;  %s795_s12 = sphi %s837_s12, %s1094_s12   ;;  %s791_s11 = sphi %s835_s11, %s1093_s11   ;;  %s787_s10 = sphi %s833_s10, %s1092_s10   ;;  %s783_s9 = sphi %s831_s9, %s1091_s9  }
   0xa   : > { %s61_s17 = sadd.s32 1, %s791_s11  ;;  %p68_p0 = scmp.ne.s32.totalorder %s791_s11, %s787_s10 }
   0xb   : > { %p69_p1 = scmp.eq.s32.totalorder %s803_s14, 0  ;;  %p74_p2 = scmp.ne.s32.totalorder %s787_s10, %s783_s9 }
   0xc   : > { %p869_p3 = scmp.eq.s32.totalorder %s570_s15, 0  ;;  %p100_p4 = scmp.eq.s32.totalorder %s570_s15, 1 }
   0xd   : > { %p70_p5 = por %p69_p1, %p68_p0  ;;  %p106_p6 = scmp.eq.s32.totalorder %s571_s16, 1 }
   0xe   : > { %p875_p7 = por %p869_p3, %p74_p2  ;;  %p879_p8 = por %p100_p4, %p68_p0 }
   0xf   : > { %p883_p9 = por %p106_p6, %p74_p2  ;;  %p572_p10 = scmp.ge.s32.totalorder %s803_s14, 1 }
  0x10   : > { %p113_p11 = scmp.lt.s32.totalorder %s803_s14, 3  ;;  %p616_p1 = scmp.lt.s32.totalorder %s803_s14, 2 }
  0x11   : > { %s1085_s21 = scalar_select %p883_p9, 1, 0 }
  0x12   : > { %p890_p13 = pnand %p572_p10, %p113_p11  ;;  %s135_s23 = sand.u32 1, %s791_s11  }
  0x13   : > { %p898_p2 = pnand %p616_p1, %p70_p5  ;;  %s31_s25 = sadd.s32 1, %s799_s13 }
  0x14   : > { %p603_p0 = pneg %p890_p13  ;;  %s575_s26 = sshll.u32 %s135_s23, 6 }
  0x15   : > { %p33_p6 = scmp.ge.s32.totalorder %s31_s25, 2  ;;  %s805_s27 = smov [#allocation2]  }
  0x16   : > { %p604_p4 = pnand %p603_p0, %p869_p3  ;;  %s1088_s0 = sld [smem:[#allocation11_spill]] }
  0x17   : > { %s1097_s25 = smov (%p33_p6, %s31_s25), 0  ;;  %s593_s30 = sshll.u32 %s799_s13, 10 }
  0x18   : > { %s56_s3 = ssub.s32 %s799_s13, %s1097_s25  ;;  %s148_s6 = scalar_lea.hbm %s1079_s1, %s593_s30 }
  0x19   : > { %p59_p5 = scmp.eq.s32.totalorder %s56_s3, 0  ;;  %s139_s7 = scalar_lea.vmem [#allocation6], %s575_s26 }
  0x1a   : > { %s149_s8 = sshll.u32 %s139_s7, 4  ;;  %s136_s16 = scalar_lea.sflag [#allocation3], %s135_s23  ;;  %s150_s8 = int_to_ptr.vmem [resolvable:$true] %s149_s8 }
  0x1b   : > { %s919_s15 = scalar_select %p59_p5, %s791_s11, %s61_s17  }
  0x1c   : > { %606 = dma.hbm_to_smem (!%p604_p4), %s1088_s0, 32, %s805_s27, [#allocation5]  }
  0x1d   : > { %p693_p10 = pneg %p898_p2  ;;  %s704_s27 = scalar_lea.vmem %s150_s8, 1024 }
  0x1e   : > { %p705_p11 = scmp.ne.s32.totalorder %s150_s8, %s704_s27  ;;  %s806_s28 = smov [#allocation6]  }
  0x1f   : > { %s709_s29 = sshll.u32 %s806_s28, 4  ;;  %s710_s29 = int_to_ptr.vmem [resolvable:$false] %s709_s29 }
  0x20   : > { %p707_p1 = pnand %p705_p11, %p693_p10  ;;  %s711_s0 = scalar_lea.vmem %s710_s29, 2048 }
  0x21   : > { %p712_p4 = scmp.lt.s32.totalorder %s150_s8, %s710_s29  ;;  %p713_p6 = scmp.lt.s32.totalorder %s711_s0, %s704_s27 }
  0x22   : > { %p708_p0 = pneg %p707_p1 }
  0x23   : > { %p714_p12 = por %p713_p6, %p712_p4 }
  0x25   : > { %p715_p9 = pnand %p714_p12, %p708_p0 }
  0x27   : > { %718 = shalt.err (!%p715_p9)
}
  0x28   : > { %s807_s26 = smov 128   ;;  %s808_s17 = smov 8  }
  0x29   : > { %610 = dma.hbm_to_vmem [thread:$0]  (!%p898_p2), %s148_s6, 1024, %s150_s8, %s136_s16, %s807_s26, %s807_s26, %s808_s17  }
  0x2a   : > { %161 = sbr.rel (%p890_p13) target bundleno = 503 (0x1f7), region = 28 }
  0x2f   : > { %770 = dma.done.wait (%p869_p3), [#allocation5], 32  }
  0x30   : > { %772 = vsyncadd (%p869_p3), [#allocation5], 4294967264  ;;  %s932_s0 = sand.u32 1, %s787_s10  }
  0x31   : > { %s580_s23 = sshll.u32 %s932_s0, 6  ;;  %s168_s30 = scalar_lea.sflag [#allocation3], %s932_s0 }
  0x32   : > { %s171_s24 = scalar_lea.vmem [#allocation6], %s580_s23 }
  0x33   : > { %774 = dma.done.wait (%p875_p7), %s168_s30, 1024  }
  0x34   : > { %776 = vsyncadd (%p875_p7), %s168_s30, 4294966272 }
  0x35   : > { %176 = sfence }
  0x36   : > { %v942_v0 = vld [vmem:[%s171_s24] sm:$0xff]  ;;  %v944_v1 = vld [vmem:[%s171_s24 + $0x8] sm:$0xff]  ;;  %v946_v2 = vld [vmem:[%s171_s24 + $0x10] sm:$0xff]  ;;  %vm203_vm0 = vcmask 130048   ;;  %vm291_vm1 = vcmask 1041409   ;;  %vm293_vm2 = vcmask 1042434  }
  0x37   : > { %v948_v3 = vld [vmem:[%s171_s24 + $0x18] sm:$0xff]  ;;  %v950_v4 = vld [vmem:[%s171_s24 + $0x20] sm:$0xff]  ;;  %v952_v5 = vld [vmem:[%s171_s24 + $0x28] sm:$0xff]  ;;  %v245_v6 = vsel %vm203_vm0, %v942_v0, -inf  ;;  %v246_v7 = vsel %vm203_vm0, %v944_v1, -inf  ;;  %v254_v8 = vsel %vm203_vm0, %v946_v2, -inf }
  0x38   : > { %v960_v9 = vld [vmem:[%s171_s24 + $0x30] sm:$0xff]  ;;  %v962_v10 = vld [vmem:[%s171_s24 + $0x38] sm:$0xff]  ;;  %v247_v11 = vmax.f32 %v245_v6, %v246_v7  ;;  %v255_v12 = vsel %vm203_vm0, %v948_v3, -inf  ;;  %v263_v13 = vsel %vm203_vm0, %v950_v4, -inf  ;;  %v264_v14 = vsel %vm203_vm0, %v952_v5, -inf  ;;  %s809_s18 = smov 16  }
  0x39   : > { %v256_v15 = vmax.f32 %v254_v8, %v255_v12  ;;  %v265_v16 = vmax.f32 %v263_v13, %v264_v14  ;;  %v272_v17 = vsel %vm203_vm0, %v960_v9, -inf  ;;  %v273_v18 = vsel %vm203_vm0, %v962_v10, -inf  ;;  %s583_s19 = sld [smem:[#allocation2 + $0x1]]  ;;  %s810_s3 = smov 113  }
  0x3a   : > { %v248_v19 = vrot.slane %v247_v11, 4  ;;  %v274_v20 = vmax.f32 %v272_v17, %v273_v18  ;;  %v204_v21 = vsel %vm203_vm0, %v942_v0, 0.0  ;;  %v205_v24 = vsel %vm203_vm0, %v944_v1, 0.0  ;;  %s584_s22 = sld [smem:[#allocation2 + $0x81]]  ;;  %s811_s4 = smov 127  }
  0x3b   : > { %v257_v22 = vrot.slane %v256_v15, 4  ;;  %v266_v23 = vrot.slane %v265_v16, 4  ;;  %v213_v25 = vsel %vm203_vm0, %v946_v2, 0.0  ;;  %v206_v28 = vadd.f32 %v205_v24, %v204_v21  ;;  %s329_s5 = sld [smem:[#allocation2]]  ;;  %s594_s16 = sshll.u32 %s795_s12, 10 }
  0x3c   : > { %v249_v26 = vmax.f32 %v247_v11, %v248_v19  ;;  %v275_v27 = vrot.slane %v274_v20, 4  ;;  %v214_v29 = vsel %vm203_vm0, %v948_v3, 0.0  ;;  %v222_v33 = vsel %vm203_vm0, %v950_v4, 0.0  ;;  %s582_s6 = sld [smem:[#allocation2 + $0x80]]  ;;  %s192_s27 = scalar_lea.vmem [#allocation7], %s580_s23 }
  0x3d   : > { %v258_v30 = vmax.f32 %v256_v15, %v257_v22  ;;  %v267_v31 = vmax.f32 %v265_v16, %v266_v23  ;;  %v215_v32 = vadd.f32 %v214_v29, %v213_v25  ;;  %v207_v36 = vrot.slane %v206_v28, 4  ;;  %s585_s7 = sld [smem:[#allocation2 + $0x2]]  ;;  %s471_s28 = sshll.u32 %s192_s27, 4  ;;  %s1022_s28 = int_to_ptr.vmem [resolvable:$true] %s471_s28 }
  0x3e   : > { %v250_v34 = vrot.slane %v249_v26, 2  ;;  %v276_v35 = vmax.f32 %v274_v20, %v275_v27  ;;  %v223_v37 = vsel %vm203_vm0, %v952_v5, 0.0  ;;  %v231_v48 = vsel %vm203_vm0, %v960_v9, 0.0  ;;  %s586_s8 = sld [smem:[#allocation2 + $0x82]]  ;;  %s1020_s26 = scalar_lea.hbm %s1080_s2, %s594_s16 }
  0x3f   : > { %v259_v38 = vrot.slane %v258_v30, 2  ;;  %v268_v39 = vrot.slane %v267_v31, 2  ;;  %v216_v40 = vrot.slane %v215_v32, 4  ;;  %v208_v43 = vadd.f32 %v207_v36, %v206_v28  ;;  %s455_s17 = scalar_lea.sflag [#allocation4], %s932_s0  ;;  %s719_s23 = scalar_lea.vmem %s1022_s28, 1024 }
  0x40   : > { %v251_v41 = vmax.f32 %v249_v26, %v250_v34  ;;  %v277_v42 = vrot.slane %v276_v35, 2  ;;  %v224_v44 = vadd.f32 %v223_v37, %v222_v33  ;;  %v232_v56 = vsel %vm203_vm0, %v962_v10, 0.0  ;;  %p720_p3 = scmp.ne.s32.totalorder %s1022_s28, %s719_s23  ;;  %s813_s30 = smov [#allocation7]  }
  0x41   : > { %v260_v45 = vmax.f32 %v258_v30, %v259_v38  ;;  %v269_v46 = vmax.f32 %v267_v31, %v268_v39  ;;  %v217_v47 = vadd.f32 %v216_v40, %v215_v32  ;;  %v209_v51 = vrot.slane %v208_v43, 2  ;;  %s723_s24 = sshll.u32 %s813_s30, 4  ;;  %s724_s24 = int_to_ptr.vmem [resolvable:$false] %s723_s24 }
  0x42   : > { %v252_v49 = vrot.slane %v251_v41, 1  ;;  %v278_v50 = vmax.f32 %v276_v35, %v277_v42  ;;  %v225_v52 = vrot.slane %v224_v44, 4  ;;  %v233_v6 = vadd.f32 %v232_v56, %v231_v48  ;;  %p721_p7 = pnand %p720_p3, %p879_p8  ;;  %p726_p12 = scmp.lt.s32.totalorder %s1022_s28, %s724_s24 }
  0x43   : > { %v261_v53 = vrot.slane %v260_v45, 1  ;;  %v270_v54 = vrot.slane %v269_v46, 1  ;;  %v218_v55 = vrot.slane %v217_v47, 2  ;;  %v210_v59 = vadd.f32 %v209_v51, %v208_v43 }
  0x44   : > { %v253_v57 = vmax.f32 %v251_v41, %v252_v49  ;;  %v279_v58 = vrot.slane %v278_v50, 1  ;;  %v226_v60 = vadd.f32 %v225_v52, %v224_v44  ;;  %vm295_vm3 = vcmask 1043459   ;;  %p722_p9 = pneg %p721_p7 }
  0x45   : > { %v262_v61 = vmax.f32 %v260_v45, %v261_v53  ;;  %v271_v62 = vmax.f32 %v269_v46, %v270_v54  ;;  %v219_v63 = vadd.f32 %v218_v55, %v217_v47  ;;  %v211_v8 = vrot.slane %v210_v59, 1 }
  0x46   : > { %v280_v7 = vmax.f32 %v278_v50, %v279_v58  ;;  %v227_v11 = vrot.slane %v226_v60, 2  ;;  %v234_v19 = vrot.slane %v233_v6, 4  ;;  %vm298_vm4 = vcmask 1047680  }
  0x47   : > { %v292_v12 = vsel %vm291_vm1, %v262_v61, %v253_v57  ;;  %v220_v13 = vrot.slane %v219_v63, 1  ;;  %v212_v17 = vadd.f32 %v211_v8, %v210_v59  ;;  %v338_v38 = vstv %s583_s19 }
  0x48   : > { %v294_v14 = vsel %vm293_vm2, %v271_v62, %v292_v12  ;;  %v228_v15 = vadd.f32 %v227_v11, %v226_v60  ;;  %v235_v21 = vadd.f32 %v234_v19, %v233_v6  ;;  %v339_v39 = vmul.f32 %v338_v38, %v253_v57 }
  0x49   : > { %v296_v16 = vsel %vm295_vm3, %v280_v7, %v294_v14  ;;  %v221_v18 = vadd.f32 %v220_v13, %v219_v63  ;;  %v241_v24 = vmul.f32 0.0625, %v212_v17  ;;  %v340_v40 = vmul.f32 %v338_v38, %v262_v61 }
  0x4a   : > { %299 = vrot.lane.b32.xlu0 %v296_v16, %s809_s18  ;;  %v229_v20 = vrot.slane %v228_v15, 1  ;;  %v236_v23 = vrot.slane %v235_v21, 2  ;;  %v341_v41 = vmul.f32 %v338_v38, %v271_v62  ;;  %v342_v42 = vmul.f32 %v338_v38, %v280_v7 }
  0x4b   : > { %v242_v25 = vmul.f32 0.0625, %v221_v18  ;;  %v347_v43 = vsel %vm291_vm1, %v340_v40, %v339_v39  ;;  %v353_v46 = vstv %s584_s22  ;;  %v281_v58 = vlaneseq }
  0x4c   : > { %v230_v22 = vadd.f32 %v229_v20, %v228_v15  ;;  %v237_v26 = vadd.f32 %v236_v23, %v235_v21  ;;  %v348_v44 = vsel %vm293_vm2, %v341_v41, %v347_v43  ;;  %v354_v49 = vmul.f32 %v353_v46, %v241_v24 }
  0x4d   : > { %v314_v29 = vsel %vm291_vm1, %v242_v25, %v241_v24  ;;  %v349_v45 = vsel %vm295_vm3, %v342_v42, %v348_v44  ;;  %v355_v50 = vmul.f32 %v353_v46, %v242_v25  ;;  %v282_v59 = vand.u32 127, %v281_v58 }
  0x4e   : > { %v243_v27 = vmul.f32 0.0625, %v230_v22  ;;  %v238_v28 = vrot.slane %v237_v26, 1  ;;  %v330_v63 = vstv %s329_s5  ;;  %v334_v7 = vstv %s582_s6 }
  0x4f   : > { %v362_v53 = vsel %vm291_vm1, %v355_v50, %v354_v49  ;;  %v283_v60 = vadd.s32 4294967295, %v282_v59  ;;  %v367_v62 = vadd.s32 1, %v282_v59  ;;  %v380_v17 = vstv %s585_s7 }
  0x50   : > { %v239_v30 = vadd.f32 %v238_v28, %v237_v26  ;;  %v315_v31 = vsel %vm293_vm2, %v243_v27, %v314_v29  ;;  %v356_v51 = vmul.f32 %v353_v46, %v243_v27  ;;  %v384_v20 = vstv %s586_s8 }
  0x51   : > { %vm284_vm5 = vcmp.ge.s32.totalorder %v283_v60, 0  ;;  %vm285_vm6 = vcmp.lt.s32.totalorder %v283_v60, 16  ;;  %vm369_vm8 = vcmp.lt.s32.totalorder %v367_v62, 16 }
  0x52   : > { %v244_v32 = vmul.f32 0.0625, %v239_v30  ;;  %v363_v54 = vsel %vm293_vm2, %v356_v51, %v362_v53  ;;  %vm286_vm7 = vmand %vm284_vm5, %vm285_vm6  ;;  %v812_v30 = vmov 1966171168  }
  0x54   : > { %v316_v33 = vsel %vm295_vm3, %v244_v32, %v315_v31  ;;  %v357_v52 = vmul.f32 %v353_v46, %v244_v32  ;;  %v395_v31 = vunpack.c.l.s4 %v812_v30 }
  0x55   : > { %318 = vrot.lane.b32.xlu0 %v316_v33, %s809_s18 }
  0x56   : > { %v364_v55 = vsel %vm295_vm3, %v357_v52, %v363_v54  ;;  %v396_v32 = vunpack.c.0.s8 %v395_v31 }
  0xbc   : > { %v300_v34 = vpop.permute.xlu0 %299 }
  0xbd   : > { %v301_v35 = vsel %vm298_vm4, %v300_v34, %v296_v16 }
  0xbe   : > { %302 = vrot.lane.b32.xlu1 %v301_v35, %s809_s18 }
  0xc7   : > { %v319_v36 = vpop.permute.xlu0 %318 }
  0xc8   : > { %v320_v37 = vsel %vm298_vm4, %v319_v36, %v316_v33 }
  0xc9   : > { %321 = vrot.lane.b32.xlu1 %v320_v37, %s809_s18  ;;  %s725_s18 = scalar_lea.vmem %s724_s24, 2048 }
  0xca   : > { %p727_p13 = scmp.lt.s32.totalorder %s725_s18, %s719_s23 }
  0xcc   : > { %p728_p2 = por %p727_p13, %p726_p12 }
  0xce   : > { %p729_p5 = pnand %p728_p2, %p722_p9 }
 0x130   : > { %v303_v47 = vpop.permute.xlu1 %302 }
 0x131   : > { %v304_v48 = vsel %vm298_vm4, %v303_v47, %v296_v16 }
 0x132   : > { %306 = vrot.lane.b32.xlu0 %v304_v48, %s810_s3 }
 0x136   : > { %371 = vrot.lane.b32.xlu0 %v304_v48, %s811_s4 }
 0x13b   : > { %v322_v56 = vpop.permute.xlu1 %321 }
 0x13c   : > { %v323_v57 = vsel %vm298_vm4, %v322_v56, %v316_v33  ;;  %v398_v33 = vshrl.u32 %v281_v58, 7 }
 0x13d   : > { %325 = vrot.lane.b32.xlu1 %v323_v57, %s810_s3 }
 0x13e   : > { %v399_v34 = vsub.s32 %v396_v32, %v398_v33  ;;  %v420_v36 = vsub.s32 0, %v398_v33 }
 0x141   : > { %375 = vrot.lane.b32.xlu1 %v323_v57, %s811_s4 }
 0x1a4   : > { %v307_v61 = vpop.permute.xlu0 %306 }
 0x1a5   : > { %v309_v6 = vsel %vm286_vm7, %v307_v61, 0.0 }
 0x1a6   : > { %v331_v12 = vmul.f32 %v330_v63, %v309_v6 }
 0x1a8   : > { %v372_v14 = vpop.permute.xlu0 %371 }
 0x1a9   : > { %v374_v18 = vsel %vm369_vm8, %v372_v14, 0.0 }
 0x1aa   : > { %v381_v23 = vmul.f32 %v380_v17, %v374_v18 }
 0x1af   : > { %v326_v8 = vpop.permute.xlu1 %325 }
 0x1b0   : > { %v328_v11 = vsel %vm286_vm7, %v326_v8, 0.0 }
 0x1b1   : > { %v335_v13 = vmul.f32 %v334_v7, %v328_v11 }
 0x1b3   : > { %v336_v15 = vadd.f32 %v335_v13, %v331_v12  ;;  %v376_v16 = vpop.permute.xlu1 %375 }
 0x1b4   : > { %v378_v21 = vsel %vm369_vm8, %v376_v16, 0.0 }
 0x1b5   : > { %v351_v19 = vadd.f32 %v349_v45, %v336_v15  ;;  %v385_v25 = vmul.f32 %v384_v20, %v378_v21 }
 0x1b7   : > { %v366_v22 = vadd.f32 %v364_v55, %v351_v19 }
 0x1b9   : > { %v382_v24 = vadd.f32 %v381_v23, %v366_v22 }
 0x1bb   : > { %v386_v26 = vadd.f32 %v385_v25, %v382_v24 }
 0x1bd   : > { %v587_v27 = vmul.f32 -1.442695, %v386_v26 }
 0x1bf   : > { %676 = vpow2.f32 %v587_v27 }
 0x1cc   : > { %v677_v28 = vpop.eup %676 }
 0x1cd   : > { %v390_v29 = vadd.f32 1.0, %v677_v28 }
 0x1cf   : > { %678 = vrcp.f32 %v390_v29 }
 0x1dc   : > { %v679_v35 = vpop.eup %678 }
 0x1dd   : > { %v400_v37 = vrot.slane %v679_v35, %v399_v34 }
 0x1df   : > { %v401_v38 = vcombine.high %v400_v37, %v400_v37  ;;  %v408_v39 = vrot.slane %v400_v37, %v399_v34 }
 0x1e1   : > { %v415_v40 = vrot.slane %v401_v38, %v399_v34  ;;  %v416_v41 = vcombine.high %v408_v39, %v408_v39  ;;  %v421_v42 = vrot.slane %v408_v39, %v420_v36 }
 0x1e3   : > { %v417_v43 = vcombine.high %v415_v40, %v415_v40  ;;  %v425_v44 = vrot.slane %v415_v40, %v420_v36  ;;  %v429_v45 = vrot.slane %v416_v41, %v420_v36  ;;  %v438_v46 = vmul.f32 %v421_v42, %v942_v0 }
 0x1e4   : > { %v439_v47 = vmul.f32 %v421_v42, %v944_v1 }
 0x1e5   : > { %v433_v48 = vrot.slane %v417_v43, %v420_v36  ;;  %v440_v49 = vmul.f32 %v425_v44, %v946_v2  ;;  %v441_v50 = vmul.f32 %v425_v44, %v948_v3  ;;  %v442_v51 = vmul.f32 %v429_v45, %v950_v4  ;;  %446 = vst.msk [vmem:[%s192_s27] sm:$0xff] %vm203_vm0, %v438_v46 }
 0x1e6   : > { %v443_v52 = vmul.f32 %v429_v45, %v952_v5  ;;  %447 = vst.msk [vmem:[%s192_s27 + $0x8] sm:$0xff] %vm203_vm0, %v439_v47 }
 0x1e7   : > { %v444_v0 = vmul.f32 %v433_v48, %v960_v9  ;;  %v445_v1 = vmul.f32 %v433_v48, %v962_v10  ;;  %448 = vst.msk [vmem:[%s192_s27 + $0x10] sm:$0xff] %vm203_vm0, %v440_v49  ;;  %449 = vst.msk [vmem:[%s192_s27 + $0x18] sm:$0xff] %vm203_vm0, %v441_v50 }
 0x1e8   : > { %450 = vst.msk [vmem:[%s192_s27 + $0x20] sm:$0xff] %vm203_vm0, %v442_v51  ;;  %451 = vst.msk [vmem:[%s192_s27 + $0x28] sm:$0xff] %vm203_vm0, %v443_v52 }
 0x1e9   : > { %452 = vst.msk [vmem:[%s192_s27 + $0x30] sm:$0xff] %vm203_vm0, %v444_v0  ;;  %453 = vst.msk [vmem:[%s192_s27 + $0x38] sm:$0xff] %vm203_vm0, %v445_v1 }
 0x1ea   : > { %732 = shalt.err (!%p729_p5)
}
 0x1eb   : > { %s733_s19 = scalar_lea.hbm %s1020_s26, 1024  ;;  %s737_s4 = scalar_lea.hbm %s1080_s2, 2048 }
 0x1ec   : > { %p734_p10 = scmp.ne.s32.totalorder %s1020_s26, %s733_s19  ;;  %p738_p0 = scmp.lt.s32.totalorder %s1020_s26, %s1080_s2 }
 0x1ed   : > { %p739_p4 = scmp.lt.s32.totalorder %s737_s4, %s733_s19 }
 0x1ee   : > { %p735_p11 = pnand %p734_p10, %p879_p8 }
 0x1ef   : > { %p740_p6 = por %p739_p4, %p738_p0 }
 0x1f0   : > { %p736_p1 = pneg %p735_p11 }
 0x1f2   : > { %p741_p3 = pnand %p740_p6, %p736_p1 }
 0x1f4   : > { %744 = shalt.err (!%p741_p3)
}
 0x1f5   : > { %s814_s7 = smov 128   ;;  %s815_s8 = smov 8  }
 0x1f6   : > { %601 = dma.vmem_to_hbm [thread:$0]  (%p879_p8), %s1022_s28, 1024, %s1020_s26, %s455_s17, %s814_s7, %s814_s7, %s815_s8  }
 0x1f7 PF: > { %s486_s16 = sand.u32 1, %s783_s9   ;;  %p1089_p7 = scmp.ne.s32.totalorder %s1085_s21, 0 }
 0x1f8   : > { %p1090_p9 = scmp.ge.s32.totalorder %s803_s14, 2  ;;  %s487_s27 = scalar_lea.sflag [#allocation4], %s486_s16 }
 0x1fa   : > { %p612_p12 = pnand %p1090_p9, %p1089_p7 }
 0x1fc   : > { %p613_p13 = pneg %p612_p12 }
 0x1fe   : > { %778 = dma.done.wait (%p613_p13), %s487_s27, 1024  }
 0x1ff   : > { %780 = vsyncadd (%p613_p13), %s487_s27, 4294966272  ;;  %s19_s14 = sadd.s32 1, %s803_s14   ;;  %s1091_s9 = smov %s787_s10 }
 0x200   : > { %p16_p2 = scmp.ge.s32.totalorder %s19_s14, 4   ;;  %s1092_s10 = smov %s791_s11 }
 0x201   : > { %s1093_s11 = smov %s919_s15  ;;  %s1094_s12 = smov %s799_s13 }
 0x202   : > { %s1095_s13 = smov %s1097_s25  ;;  %18 = sbr.rel (!%p16_p2) target bundleno = 9 (0x9), region = 78 }
 0x207   :  { %492 = vsyncpa [#allocation3], 1 }
 0x208   :  { %494 = vsyncpa [#allocation3 + $0x1], 1 }
 0x209   :  { %495 = vsyncpa [#allocation4], 1 }
 0x20a   :  { %497 = vsyncpa [#allocation4 + $0x1], 1 }
 0x20b   :  { %498 = vsyncpa [#allocation5], 1 }
 0x20c   :  { %500 = vsyncpa [#allocation5 + $0x1], 1 }

</bundles_post_ra>
